<compile_context>
chip_gen: v7x
topology: tpu7x:2x2x1
jax: 0.10.0
libtpu: 0.0.40
codegen_flags: <defaults>
</compile_context>

<pallas_src>
import jax
import jax.numpy as jnp
from jax.experimental import pallas as pl
from jax.experimental.pallas import tpu as pltpu

F_IN = 1433     # input feature dim (from self_lin_src_weight [64, 1433])
F_OUT = 64      # linear output dim
H = 8           # heads
D = 8           # per-head dim (H * D == F_OUT)
W_COLS = 128    # lane-dense fused weight / output width (64 y + 8 src + 8 dst + pad)


def gat_kernel(x_ref, w_ref, o_ref):
    # x_ref: (tile, 1433)   un-padded feature rows (Mosaic lane-pads in VMEM)
    # w_ref: (1433, 128)    fused [W.T | W.T@a_src | W.T@a_dst | 0] weight
    # o_ref: (tile, 128)    cols 0:64 = linear, 64:72 = sum_1, 72:80 = sum_2
    o_ref[...] = jnp.dot(x_ref[...], w_ref[...],
                         preferred_element_type=jnp.float32)


def _row_tiling(n, tn):
    """Pick (tile_rows, num_blocks): tile_rows % 8 == 0, every block starts
    inside the array, and (when possible) an even block count so both v7x
    TensorCores get work (no effect on v5e/v6e's single TC)."""
    if n <= 8:
        return 8, 1
    nb = pl.cdiv(n, tn)
    if nb < 2:
        nb = 2          # at least 2 blocks for 2-TC sharding
    elif nb % 2:
        nb += 1         # even grid length
    tile = pl.cdiv(pl.cdiv(n, nb), 8) * 8
    return tile, pl.cdiv(n, tile)   # recompute nb: every block starts < n


def gat_forward(x, lin_weight, att_src, att_dst, *, tn=1024):
    """Reproduces Repro.forward.

    x:          [N, 1433] float32
    lin_weight: [64, 1433] float32   (PyTorch nn.Linear-style weight)
    att_src:    [1, 8, 8]  float32
    att_dst:    [1, 8, 8]  float32
    returns (view [N,8,8], sum_1 [N,8], sum_2 [N,8])
    """
    N = x.shape[0]
    dtype = x.dtype

    # ---- fused weight: [1433, 128] (tiny; building it is negligible) -------
    wt = lin_weight.T                                   # [1433, 64]
    wt_h = wt.reshape(F_IN, H, D)                       # [1433, 8, 8]
    src_cols = jnp.einsum('khd,hd->kh', wt_h, att_src[0])   # [1433, 8]
    dst_cols = jnp.einsum('khd,hd->kh', wt_h, att_dst[0])   # [1433, 8]
    w_full = jnp.concatenate(
        [wt, src_cols, dst_cols,
         jnp.zeros((F_IN, W_COLS - F_OUT - 2 * H), dtype)], axis=1)

    # ---- row tiling (no row-pad copy of x; last block reads garbage rows) --
    tile, nb = _row_tiling(N, tn)
    n_out = nb * tile          # output is allocated padded; sliced below

    flops = 2 * n_out * F_IN * W_COLS
    bytes_accessed = 4 * (N * F_IN + F_IN * W_COLS + n_out * W_COLS)

    out = pl.pallas_call(
        gat_kernel,
        out_shape=jax.ShapeDtypeStruct((n_out, W_COLS), jnp.float32),
        grid_spec=pltpu.PrefetchScalarGridSpec(
            num_scalar_prefetch=0,
            grid=(nb,),
            in_specs=[
                pl.BlockSpec((tile, F_IN), lambda i: (i, 0)),
                pl.BlockSpec((F_IN, W_COLS), lambda i: (0, 0)),
            ],
            out_specs=pl.BlockSpec((tile, W_COLS), lambda i: (i, 0)),
        ),
        compiler_params=pltpu.CompilerParams(
            dimension_semantics=("parallel",),
            vmem_limit_bytes=32 * 1024 * 1024,   # conservative for v7x's 64 MiB VMEM
        ),
        cost_estimate=pl.CostEstimate(
            flops=flops, transcendentals=0, bytes_accessed=bytes_accessed),
    )(x, w_full)

    view = out[:N, :F_OUT].reshape(N, H, D)     # glue reshape: linear.view(-1,8,8)
    s1 = out[:N, F_OUT:F_OUT + H]
    s2 = out[:N, F_OUT + H:F_OUT + 2 * H]
    return view, s1, s2


if __name__ == "__main__":
    key = jax.random.PRNGKey(0)
    k_x, k_w, k_as, k_ad, k_x2 = jax.random.split(key, 5)

    lin_weight = jax.random.normal(k_w, (F_OUT, F_IN), dtype=jnp.float32)
    att_src = jax.random.normal(k_as, (1, H, D), dtype=jnp.float32)
    att_dst = jax.random.normal(k_ad, (1, H, D), dtype=jnp.float32)

    def ref(x):
        v = jnp.dot(x, lin_weight.T,
                    precision=jax.lax.Precision.HIGHEST).reshape(-1, H, D)
        return v, (v * att_src).sum(-1), (v * att_dst).sum(-1)

    # Tolerances: values are O(sqrt(1433)) ~ 40-100; allow for MXU f32 rounding
    # and the (mathematically exact) reassociation of the fused head reduction.
    RTOL, ATOL = 1e-3, 1e-2

    # Case 1: small, tile-aligned node count (even 2-block grid path).
    N1 = 32
    x1 = jax.random.normal(k_x, (N1, F_IN), dtype=jnp.float32)
    view, s1, s2 = gat_forward(x1, lin_weight, att_src, att_dst)
    jax.block_until_ready((view, s1, s2))
    rv, r1, r2 = ref(x1)
    assert view.shape == (N1, H, D) and s1.shape == (N1, H) and s2.shape == (N1, H)
    assert jnp.allclose(view, rv, rtol=RTOL, atol=ATOL)
    assert jnp.allclose(s1, r1, rtol=RTOL, atol=ATOL)
    assert jnp.allclose(s2, r2, rtol=RTOL, atol=ATOL)

    # Case 2: ragged node count (exercises the partial last block / OOB rows).
    N2 = 37
    x2 = jax.random.normal(k_x2, (N2, F_IN), dtype=jnp.float32)
    view2, s1b, s2b = gat_forward(x2, lin_weight, att_src, att_dst)
    jax.block_until_ready((view2, s1b, s2b))
    rv2, r1b, r2b = ref(x2)
    assert view2.shape == (N2, H, D) and s1b.shape == (N2, H) and s2b.shape == (N2, H)
    assert jnp.allclose(view2, rv2, rtol=RTOL, atol=ATOL)
    assert jnp.allclose(s1b, r1b, rtol=RTOL, atol=ATOL)
    assert jnp.allclose(s2b, r2b, rtol=RTOL, atol=ATOL)

    print("KERNEL_OK")
</pallas_src>

<mosaic_0001>
module attributes {stable_mosaic.version = 11 : i64} {
  func.func @gat_kernel(%arg0: i32, %arg1: memref<16x1433xf32, #tpu.memory_space<vmem>>, %arg2: memref<1433x128xf32, #tpu.memory_space<vmem>>, %arg3: memref<16x128xf32, #tpu.memory_space<vmem>>) attributes {dimension_semantics = [#tpu.dimension_semantics<parallel>], iteration_bounds = array<i64: 2>, scalar_prefetch = 0 : i64, scratch_operands = 0 : i64, tpu.core_type = #tpu.core_type<tc>, window_params = [{transform_indices = @transform_0, window_bounds = array<i64: 16, 1433>}, {pipeline_mode = #tpu.pipeline_mode<synchronous>, transform_indices = @transform_1, window_bounds = array<i64: 1433, 128>}, {transform_indices = @transform_2, window_bounds = array<i64: 16, 128>}]} {
    %c0 = arith.constant 0 : index
    %c0_0 = arith.constant 0 : index
    %0 = vector.load %arg1[%c0, %c0_0] : memref<16x1433xf32, #tpu.memory_space<vmem>>, vector<16x1433xf32>
    %c0_1 = arith.constant 0 : index
    %c0_2 = arith.constant 0 : index
    %1 = vector.load %arg2[%c0_1, %c0_2] : memref<1433x128xf32, #tpu.memory_space<vmem>>, vector<1433x128xf32>
    %cst = arith.constant dense<0.000000e+00> : vector<16x128xf32>
    %2 = tpu.matmul %0, %1, %cst {dimension_numbers = #tpu.dot_dimension_numbers<[1], [0], [0], [1], [0, 0, 1, 1], [], []>} : vector<16x1433xf32>, vector<1433x128xf32>, vector<16x128xf32> -> vector<16x128xf32>
    %c0_3 = arith.constant 0 : index
    %c0_4 = arith.constant 0 : index
    %3 = vector.load %arg3[%c0_3, %c0_4] : memref<16x128xf32, #tpu.memory_space<vmem>>, vector<16x128xf32>
    tpu.vector_store %arg3[%c0_3, %c0_4], %2 {strides = array<i32>} : memref<16x128xf32, #tpu.memory_space<vmem>>, vector<16x128xf32>,
    return
  }
  func.func @transform_0(%arg0: i32) -> (i32, i32) {
    %c0_i32 = arith.constant 0 : i32
    %c0_i32_0 = arith.constant 0 : i32
    return %arg0, %c0_i32 : i32, i32
  }
  func.func @transform_1(%arg0: i32) -> (i32, i32) {
    %c0_i32 = arith.constant 0 : i32
    %c0_i32_0 = arith.constant 0 : i32
    %c0_i32_1 = arith.constant 0 : i32
    return %c0_i32, %c0_i32_0 : i32, i32
  }
  func.func @transform_2(%arg0: i32) -> (i32, i32) {
    %c0_i32 = arith.constant 0 : i32
    %c0_i32_0 = arith.constant 0 : i32
    return %arg0, %c0_i32 : i32, i32
  }
}

</mosaic_0001>

<bundles_post_ra>
// kernel: tpu_custom_call.1
= control target key start
LH: loop header
LB: loop body
LE: loop exit
PB: predicated region body
PF: predicated region fallthrough
CT: control target
= control target key end

     0   :  { %7 = vsyncpa [#allocation3], 0  ;;  %s1808_s0 = inlined_call_operand.hbm [shape: f32[32,1433], index: 0, kind: input, shape index: {}]   ;;  %s1809_s1 = inlined_call_operand.hbm [shape: f32[1433,128], index: 1, kind: input, shape index: {}]   ;;  %s1810_s2 = inlined_call_operand.hbm [shape: f32[32,128], index: 2, kind: output, shape index: {}]  }
   0x1   :  { %9 = vsyncpa [#allocation3 + $0x1], 0 }
   0x2   :  { %10 = vsyncpa [#allocation6], 0 }
   0x3   :  { %11 = vsyncpa [#allocation4], 0 }
   0x4   :  { %13 = vsyncpa [#allocation4 + $0x1], 0  ;;  %s1568_s9 = smov 0   ;;  %s1570_s10 = smov 0  }
   0x5   :  { %s1572_s11 = smov 0   ;;  %s1574_s12 = smov 0  }
   0x6 LB: > { %s1589_s13 = sadd.s32 4294967295, %s1540_s12   ;;  %s944_s14 = sadd.s32 4294967294, %s1540_s12   ;;  %s1540_s12 = sphi %s1574_s12, %s1830_s12   ;;  %s1536_s11 = sphi %s1572_s11, %s1829_s11   ;;  %s1532_s10 = sphi %s1570_s10, %s1828_s10   ;;  %s1528_s9 = sphi %s1568_s9, %s1827_s9  }
   0x7   : > { %p39_p0 = scmp.ne.s32.totalorder %s1532_s10, %s1528_s9  ;;  %p1811_p1 = scmp.eq.s32.totalorder %s1589_s13, 0 }
   0x8   : > { %p90_p3 = scmp.eq.s32.totalorder %s944_s14, 1  ;;  %p945_p5 = scmp.ge.s32.totalorder %s1540_s12, 1 }
   0x9   : > { %p1598_p4 = por %p1811_p1, %p39_p0  ;;  %p97_p7 = scmp.lt.s32.totalorder %s1540_s12, 3 }
   0xa   : > { %p1603_p6 = por %p90_p3, %p39_p0  ;;  %s1542_s18 = smov [#allocation5]  }
   0xb   : > { %s1814_s15 = scalar_select %p1598_p4, 1, 0 }
   0xc   : > { %s1815_s16 = scalar_select %p1603_p6, 1, 0 }
   0xd   : > { %p1608_p8 = pnand %p945_p5, %p97_p7  ;;  %s109_s19 = sshll.u32 %s1542_s18, 4  ;;  %s1612_s19 = int_to_ptr.vmem [resolvable:$true] %s109_s19 }
   0xe   : > { %s1624_s21 = sadd.s32 1, %s1540_s12   ;;  %s26_s22 = sadd.s32 1, %s1536_s11 }
   0xf   : > { %s1816_s17 = scalar_select %p1608_p8, 1, 0 }
  0x10   : > { %p1355_p9 = pneg %p1608_p8  ;;  %s23_s23 = ssub.s32 %s1540_s12, %s1624_s21 }
  0x11   : > { %s1412_s26 = scalar_lea.hbm %s1809_s1, 23040 }
  0x12   : > { %p1619_p11 = pnand %p1355_p9, %p1811_p1  ;;  %p1413_p12 = scmp.ne.s32.totalorder %s1809_s1, %s1412_s26 }
  0x13   : > { %p1419_p5 = scmp.lt.u32.totalorder %s1412_s26, %s1809_s1 }
  0x14   : > { %p1414_p13 = pneg %p1619_p11 }
  0x16   : > { %p1415_p0 = pnand %p1414_p13, %p1413_p12 }
  0x18   : > { %p1416_p3 = pneg %p1415_p0 }
  0x1a   : > { %p1421_p7 = pnand %p1419_p5, %p1416_p3 }
  0x1c   : > { %1424 = shalt.err (!%p1421_p7)
}
  0x1d   : > { %s1425_s3 = scalar_lea.vmem %s1612_s19, 23040  ;;  %p1433_p2 = scmp.lt.s32.totalorder %s1612_s19, %s1612_s19 }
  0x1e   : > { %p1426_p9 = scmp.ne.s32.totalorder %s1612_s19, %s1425_s3  ;;  %p1434_p6 = scmp.lt.s32.totalorder %s1425_s3, %s1425_s3 }
  0x20   : > { %p1428_p10 = pnand %p1426_p9, %p1414_p13  ;;  %p1435_p4 = por %p1434_p6, %p1433_p2 }
  0x22   : > { %p1429_p1 = pneg %p1428_p10 }
  0x24   : > { %p1436_p8 = pnand %p1435_p4, %p1429_p1 }
  0x26   : > { %1439 = shalt.err (!%p1436_p8)
}
  0x27   : > { %s1543_s4 = smov 128   ;;  %s1544_s5 = smov 8  }
  0x28   : > { %1358 = dma.hbm_to_vmem [thread:$0]  (!%p1619_p11), %s1809_s1, 23040, %s1612_s19, [#allocation6], %s1543_s4, %s1543_s4, %s1544_s5  }
  0x29   : > { %p24_p2 = scmp.eq.s32.totalorder %s23_s23, 0  ;;  %p33_p1 = scmp.ne.s32.totalorder %s1536_s11, %s1532_s10 }
  0x2a   : > { %p34_p4 = scmp.eq.s32.totalorder %s1540_s12, 0  ;;  %p1368_p6 = scmp.lt.s32.totalorder %s1540_s12, 2 }
  0x2b   : > { %s1655_s8 = scalar_select %p24_p2, %s1536_s11, %s26_s22  }
  0x2c   : > { %p35_p8 = por %p34_p4, %p33_p1  ;;  %p1818_p10 = scmp.eq.s32.totalorder %s1589_s13, 1 }
  0x2d   : > { %s123_s18 = sand.u32 1, %s1536_s11   ;;  %s1345_s24 = smul.u32 3072, %s1540_s12 }
  0x2e   : > { %p1659_p12 = por %p1818_p10, %p33_p1  ;;  %s1344_s25 = smul.u32 192, %s123_s18 }
  0x2f   : > { %s1668_s27 = scalar_lea.hbm %s1808_s0, %s1345_s24  ;;  %p1670_p11 = pnand %p1368_p6, %p35_p8 }
  0x30   : > { %s127_s22 = scalar_lea.vmem [#allocation2], %s1344_s25  ;;  %s1676_s28 = scalar_lea.sflag [#allocation3], %s123_s18 }
  0x31   : > { %s135_s23 = sshll.u32 %s127_s22, 4  ;;  %s1440_s29 = scalar_lea.hbm %s1668_s27, 3072  ;;  %s1674_s23 = int_to_ptr.vmem [resolvable:$true] %s135_s23 }
  0x32   : > { %p1441_p13 = scmp.ne.s32.totalorder %s1668_s27, %s1440_s29  ;;  %p1442_p0 = pneg %p1670_p11 }
  0x33   : > { %s1445_s4 = scalar_lea.hbm %s1808_s0, 6144  ;;  %p1446_p7 = scmp.lt.u32.totalorder %s1668_s27, %s1808_s0 }
  0x34   : > { %p1443_p3 = pnand %p1442_p0, %p1441_p13  ;;  %p1447_p9 = scmp.lt.u32.totalorder %s1445_s4, %s1440_s29 }
  0x35   : > { %p1449_p1 = scmp.lt.u32.totalorder %s1440_s29, %s1668_s27 }
  0x36   : > { %p1444_p5 = pneg %p1443_p3  ;;  %p1448_p2 = por %p1447_p9, %p1446_p7 }
  0x38   : > { %p1450_p4 = por %p1449_p1, %p1448_p2 }
  0x3a   : > { %p1451_p6 = pnand %p1450_p4, %p1444_p5 }
  0x3c   : > { %1454 = shalt.err (!%p1451_p6)
}
  0x3d   : > { %s1455_s7 = scalar_lea.vmem %s1674_s23, 3072  ;;  %s1545_s18 = smov [#allocation2]  }
  0x3e   : > { %p1456_p8 = scmp.ne.s32.totalorder %s1674_s23, %s1455_s7  ;;  %s1460_s24 = sshll.u32 %s1545_s18, 4  ;;  %s1461_s24 = int_to_ptr.vmem [resolvable:$false] %s1460_s24 }
  0x3f   : > { %s1462_s25 = scalar_lea.vmem %s1461_s24, 6144  ;;  %p1463_p3 = scmp.lt.s32.totalorder %s1674_s23, %s1461_s24 }
  0x40   : > { %p1458_p10 = pnand %p1456_p8, %p1442_p0  ;;  %p1464_p7 = scmp.lt.s32.totalorder %s1462_s25, %s1455_s7 }
  0x42   : > { %p1459_p13 = pneg %p1458_p10  ;;  %p1465_p9 = por %p1464_p7, %p1463_p3 }
  0x44   : > { %p1466_p2 = pnand %p1465_p9, %p1459_p13 }
  0x46   : > { %1469 = shalt.err (!%p1466_p2)
}
  0x47   : > { %s1546_s20 = smov 1536   ;;  %s1547_s26 = smov 96  }
  0x48   : > { %1362 = dma.hbm_to_vmem [thread:$0]  (!%p1670_p11), %s1668_s27, 3072, %s1674_s23, %s1676_s28, %s1546_s20, %s1546_s20, %s1547_s26  }
  0x49   : > { %p1821_p0 = scmp.ne.s32.totalorder %s1816_s17, 0 }
  0x4a   : > { %s1707_s22 = sand.u32 (!%p1821_p0), 1, %s1532_s10   ;;  %p1822_p5 = scmp.ne.s32.totalorder (!%p1821_p0), %s1814_s15, 0 }
  0x4b   : > { %147 = sbr.rel (%p1821_p0) target bundleno = 428 (0x1ac), region = 28  ;;  %s150_s30 = scalar_lea.sflag (!%p1821_p0), [#allocation3], %s1707_s22 }
  0x4c   : > { %s1346_s29 = smul.u32 (!%p1821_p0), 192, %s1707_s22 }
  0x4e   : > { %s1711_s3 = scalar_lea.vmem (!%p1821_p0), [#allocation2], %s1346_s29 }
  0x52   : > { %1515 = dma.done.wait (%p1822_p5), %s150_s30, 3072  }
  0x53   : > { %1517 = vsyncadd (%p1822_p5), %s150_s30, 4294964224  ;;  %p1823_p11 = scmp.eq.s32.totalorder %s1589_s13, 0 }
  0x55   : > { %1519 = dma.done.wait (%p1823_p11), [#allocation6], 23040   ;;  %p1824_p1 = pmov %p1823_p11 }
  0x56   : > { %v220_v0 = vld [vmem:[#allocation5 + $0x80] sm:$0xff]  ;;  %v221_v1 = vld [vmem:[#allocation5 + $0x88] sm:$0xff]  ;;  %v222_v11 = vld [vmem:[#allocation5 + $0x90] sm:$0xff]  ;;  %vm384_vm0 = vcmask 203776   ;;  %vm391_vm1 = vcmask 1040384   ;;  %vm1549_vm2 = vmmov 1  }
  0x57   : > { %1521 = vsyncadd (%p1824_p1), [#allocation6], 4294944256  ;;  %v252_v2 = vld [vmem:[#allocation5 + $0x180] sm:$0xff]  ;;  %v1153_v3 = vpack.c.bf16 %v221_v1, %v220_v0  ;;  %v253_v4 = vld [vmem:[#allocation5 + $0x188] sm:$0xff]  ;;  %s953_s15 = sshll.u32 %s1707_s22, 4  ;;  %s962_s19 = sshll.u32 %s1589_s13, 8 }
  0x58   : > { %v204_v5 = vld [vmem:[#allocation5] sm:$0xff]  ;;  %v205_v6 = vld [vmem:[#allocation5 + $0x8] sm:$0xff]  ;;  %v1185_v7 = vpack.c.bf16 %v253_v4, %v252_v2  ;;  %v223_v13 = vld [vmem:[#allocation5 + $0x98] sm:$0xff]  ;;  %s177_s17 = scalar_lea.vmem [#allocation7], %s953_s15  ;;  %s1764_s4 = scalar_lea.hbm %s1810_s2, %s962_s19 }
  0x59   : > { %v1155_v8 = vpack.c.bf16 %v205_v6, %v204_v5  ;;  %v236_v9 = vld [vmem:[#allocation5 + $0x100] sm:$0xff]  ;;  %v237_v10 = vld [vmem:[#allocation5 + $0x108] sm:$0xff]  ;;  %1154 = vmatprep.subr.bf16.mxu0 %v1153_v3  ;;  %v254_v14 = vld [vmem:[#allocation5 + $0x190] sm:$0xff]  ;;  %v1157_v16 = vpack.c.bf16 %v223_v13, %v222_v11  ;;  %s861_s27 = sshll.u32 %s177_s17, 4  ;;  %s848_s5 = scalar_lea.sflag [#allocation4], %s1707_s22  ;;  %s1759_s27 = int_to_ptr.vmem [resolvable:$true] %s861_s27 }
  0x5a   : > { %v1187_v12 = vpack.c.bf16 %v237_v10, %v236_v9  ;;  %v255_v15 = vld [vmem:[#allocation5 + $0x198] sm:$0xff]  ;;  %1186 = vmatprep.subr.bf16.mxu1 %v1185_v7  ;;  %v206_v18 = vld [vmem:[#allocation5 + $0x10] sm:$0xff]  ;;  %v224_v23 = vld [vmem:[#allocation5 + $0xa0] sm:$0xff]  ;;  %s1470_s6 = scalar_lea.vmem %s1759_s27, 256  ;;  %s1550_s13 = smov [#allocation7]  }
  0x5b   : > { %1156 = vmatpush3.bf16.msra.mxu0 %v1155_v8  ;;  %v1189_v17 = vpack.c.bf16 %v255_v15, %v254_v14  ;;  %v207_v19 = vld [vmem:[#allocation5 + $0x18] sm:$0xff]  ;;  %v238_v20 = vld [vmem:[#allocation5 + $0x110] sm:$0xff]  ;;  %v225_v24 = vld [vmem:[#allocation5 + $0xa8] sm:$0xff]  ;;  %p1471_p4 = scmp.ne.s32.totalorder %s1759_s27, %s1470_s6  ;;  %s1474_s7 = sshll.u32 %s1550_s13, 4  ;;  %s1475_s7 = int_to_ptr.vmem [resolvable:$false] %s1474_s7 }
  0x5c   : > { %1188 = vmatpush3.bf16.msra.mxu1 %v1187_v12  ;;  %v1159_v21 = vpack.c.bf16 %v207_v19, %v206_v18  ;;  %v239_v22 = vld [vmem:[#allocation5 + $0x118] sm:$0xff]  ;;  %1158 = vmatprep.subr.bf16.mxu0 %v1157_v16  ;;  %v1161_v26 = vpack.c.bf16 %v225_v24, %v224_v23  ;;  %v256_v27 = vld [vmem:[#allocation5 + $0x1a0] sm:$0xff]  ;;  %v257_v28 = vld [vmem:[#allocation5 + $0x1a8] sm:$0xff]  ;;  %s1476_s18 = scalar_lea.vmem %s1475_s7, 512  ;;  %p1477_p10 = scmp.lt.s32.totalorder %s1759_s27, %s1475_s7 }
  0x5d   : > { %1190 = vmatprep.subr.bf16.mxu1 %v1189_v17  ;;  %v1191_v25 = vpack.c.bf16 %v239_v22, %v238_v20  ;;  %v208_v29 = vld [vmem:[#allocation5 + $0x20] sm:$0xff]  ;;  %v1193_v30 = vpack.c.bf16 %v257_v28, %v256_v27  ;;  %v209_v31 = vld [vmem:[#allocation5 + $0x28] sm:$0xff]  ;;  %v226_v35 = vld [vmem:[#allocation5 + $0xb0] sm:$0xff]  ;;  %p1472_p6 = pnand %p1471_p4, %p1659_p12  ;;  %p1478_p13 = scmp.lt.s32.totalorder %s1476_s18, %s1470_s6 }
  0x5e   : > { %v240_v32 = vld [vmem:[#allocation5 + $0x120] sm:$0xff]  ;;  %v241_v33 = vld [vmem:[#allocation5 + $0x128] sm:$0xff]  ;;  %v1163_v34 = vpack.c.bf16 %v209_v31, %v208_v29  ;;  %v227_v36 = vld [vmem:[#allocation5 + $0xb8] sm:$0xff] }
  0x5f   : > { %1160 = vmatpush3.bf16.msra.mxu0 %v1159_v21  ;;  %v258_v37 = vld [vmem:[#allocation5 + $0x1b0] sm:$0xff]  ;;  %v1195_v38 = vpack.c.bf16 %v241_v33, %v240_v32  ;;  %v1165_v39 = vpack.c.bf16 %v227_v36, %v226_v35  ;;  %v259_v40 = vld [vmem:[#allocation5 + $0x1b8] sm:$0xff]  ;;  %v228_v46 = vld [vmem:[#allocation5 + $0xc0] sm:$0xff]  ;;  %p1473_p8 = pneg %p1472_p6  ;;  %p1479_p3 = por %p1478_p13, %p1477_p10 }
  0x60   : > { %1192 = vmatpush3.bf16.msra.mxu1 %v1191_v25  ;;  %1162 = vmatprep.subr.bf16.mxu0 %v1161_v26  ;;  %v210_v41 = vld [vmem:[#allocation5 + $0x30] sm:$0xff]  ;;  %v211_v42 = vld [vmem:[#allocation5 + $0x38] sm:$0xff]  ;;  %v1197_v43 = vpack.c.bf16 %v259_v40, %v258_v37  ;;  %v229_v47 = vld [vmem:[#allocation5 + $0xc8] sm:$0xff] }
  0x61   : > { %1194 = vmatprep.subr.bf16.mxu1 %v1193_v30  ;;  %v242_v44 = vld [vmem:[#allocation5 + $0x130] sm:$0xff]  ;;  %v243_v45 = vld [vmem:[#allocation5 + $0x138] sm:$0xff]  ;;  %v260_v48 = vld [vmem:[#allocation5 + $0x1c0] sm:$0xff]  ;;  %v1167_v50 = vpack.c.bf16 %v211_v42, %v210_v41  ;;  %v1169_v52 = vpack.c.bf16 %v229_v47, %v228_v46  ;;  %p1480_p7 = pnand %p1479_p3, %p1473_p8 }
  0x62   : > { %v261_v49 = vld [vmem:[#allocation5 + $0x1c8] sm:$0xff]  ;;  %v1199_v51 = vpack.c.bf16 %v243_v45, %v242_v44  ;;  %v212_v53 = vld [vmem:[#allocation5 + $0x40] sm:$0xff]  ;;  %v230_v58 = vld [vmem:[#allocation5 + $0xd0] sm:$0xff] }
  0x63   : > { %1164 = vmatpush3.bf16.msra.mxu0 %v1163_v34  ;;  %v213_v54 = vld [vmem:[#allocation5 + $0x48] sm:$0xff]  ;;  %v244_v55 = vld [vmem:[#allocation5 + $0x140] sm:$0xff]  ;;  %v1201_v56 = vpack.c.bf16 %v261_v49, %v260_v48  ;;  %v231_v59 = vld [vmem:[#allocation5 + $0xd8] sm:$0xff] }
  0x64   : > { %1196 = vmatpush3.bf16.msra.mxu1 %v1195_v38  ;;  %1166 = vmatprep.subr.bf16.mxu0 %v1165_v39  ;;  %v245_v57 = vld [vmem:[#allocation5 + $0x148] sm:$0xff]  ;;  %v262_v60 = vld [vmem:[#allocation5 + $0x1d0] sm:$0xff]  ;;  %v263_v61 = vld [vmem:[#allocation5 + $0x1d8] sm:$0xff]  ;;  %v1171_v62 = vpack.c.bf16 %v213_v54, %v212_v53  ;;  %v1173_v0 = vpack.c.bf16 %v231_v59, %v230_v58 }
  0x65   : > { %1198 = vmatprep.subr.bf16.mxu1 %v1197_v43  ;;  %v1203_v63 = vpack.c.bf16 %v245_v57, %v244_v55  ;;  %v214_v1 = vld [vmem:[#allocation5 + $0x50] sm:$0xff]  ;;  %v215_v2 = vld [vmem:[#allocation5 + $0x58] sm:$0xff]  ;;  %v1205_v4 = vpack.c.bf16 %v263_v61, %v262_v60  ;;  %v232_v6 = vld [vmem:[#allocation5 + $0xe0] sm:$0xff] }
  0x66   : > { %v246_v3 = vld [vmem:[#allocation5 + $0x150] sm:$0xff]  ;;  %v247_v5 = vld [vmem:[#allocation5 + $0x158] sm:$0xff]  ;;  %v233_v7 = vld [vmem:[#allocation5 + $0xe8] sm:$0xff]  ;;  %v1175_v10 = vpack.c.bf16 %v215_v2, %v214_v1 }
  0x67   : > { %1168 = vmatpush3.bf16.msra.mxu0 %v1167_v50  ;;  %v264_v8 = vld [vmem:[#allocation5 + $0x1e0] sm:$0xff]  ;;  %v265_v9 = vld [vmem:[#allocation5 + $0x1e8] sm:$0xff]  ;;  %v1207_v13 = vpack.c.bf16 %v247_v5, %v246_v3  ;;  %v1177_v14 = vpack.c.bf16 %v233_v7, %v232_v6  ;;  %v183_v17 = vld [vmem:[%s1711_s3 + $0x18] sm:$0xff] }
  0x68   : > { %1200 = vmatpush3.bf16.msra.mxu1 %v1199_v51  ;;  %1170 = vmatprep.subr.bf16.mxu0 %v1169_v52  ;;  %v216_v11 = vld [vmem:[#allocation5 + $0x60] sm:$0xff]  ;;  %v217_v12 = vld [vmem:[#allocation5 + $0x68] sm:$0xff]  ;;  %v1209_v18 = vpack.c.bf16 %v265_v9, %v264_v8  ;;  %v234_v20 = vld [vmem:[#allocation5 + $0xf0] sm:$0xff] }
  0x69   : > { %1202 = vmatprep.subr.bf16.mxu1 %v1201_v56  ;;  %v248_v15 = vld [vmem:[#allocation5 + $0x160] sm:$0xff]  ;;  %v181_v16 = vld [vmem:[%s1711_s3 + $0x8] sm:$0xff]  ;;  %v235_v21 = vld [vmem:[#allocation5 + $0xf8] sm:$0xff]  ;;  %534 = vmatprep.mubr.f32.mxu1 %v183_v17  ;;  %v1179_v24 = vpack.c.bf16 %v217_v12, %v216_v11 }
  0x6a   : > { %v249_v19 = vld [vmem:[#allocation5 + $0x168] sm:$0xff]  ;;  %459 = vmatprep.mubr.f32.mxu0 %v181_v16  ;;  %v266_v22 = vld [vmem:[#allocation5 + $0x1f0] sm:$0xff]  ;;  %v267_v23 = vld [vmem:[#allocation5 + $0x1f8] sm:$0xff]  ;;  %v1181_v26 = vpack.c.bf16 %v235_v21, %v234_v20 }
  0x6b   : > { %1172 = vmatpush3.bf16.msra.mxu0 %v1171_v62  ;;  %v1211_v25 = vpack.c.bf16 %v249_v19, %v248_v15  ;;  %v218_v27 = vld [vmem:[#allocation5 + $0x70] sm:$0xff]  ;;  %v219_v28 = vld [vmem:[#allocation5 + $0x78] sm:$0xff]  ;;  %v1213_v30 = vpack.c.bf16 %v267_v23, %v266_v22  ;;  %v284_v32 = vld [vmem:[#allocation5 + $0x280] sm:$0xff] }
  0x6c   : > { %1204 = vmatpush3.bf16.msra.mxu1 %v1203_v63  ;;  %1174 = vmatprep.subr.bf16.mxu0 %v1173_v0  ;;  %v250_v29 = vld [vmem:[#allocation5 + $0x170] sm:$0xff]  ;;  %v251_v31 = vld [vmem:[#allocation5 + $0x178] sm:$0xff]  ;;  %v285_v33 = vld [vmem:[#allocation5 + $0x288] sm:$0xff]  ;;  %v1183_v36 = vpack.c.bf16 %v219_v28, %v218_v27 }
  0x6d   : > { %1206 = vmatprep.subr.bf16.mxu1 %v1205_v4  ;;  %v316_v34 = vld [vmem:[#allocation5 + $0x380] sm:$0xff]  ;;  %v317_v35 = vld [vmem:[#allocation5 + $0x388] sm:$0xff]  ;;  %v1215_v37 = vpack.c.bf16 %v251_v31, %v250_v29  ;;  %v1217_v38 = vpack.c.bf16 %v285_v33, %v284_v32  ;;  %v286_v44 = vld [vmem:[#allocation5 + $0x290] sm:$0xff] }
  0x6e   : > { %v268_v39 = vld [vmem:[#allocation5 + $0x200] sm:$0xff]  ;;  %v269_v40 = vld [vmem:[#allocation5 + $0x208] sm:$0xff]  ;;  %v1249_v42 = vpack.c.bf16 %v317_v35, %v316_v34  ;;  %v287_v45 = vld [vmem:[#allocation5 + $0x298] sm:$0xff] }
  0x6f   : > { %1176 = vmatpush3.bf16.msra.mxu0 %v1175_v10  ;;  %v300_v41 = vld [vmem:[#allocation5 + $0x300] sm:$0xff]  ;;  %v301_v43 = vld [vmem:[#allocation5 + $0x308] sm:$0xff]  ;;  %v318_v46 = vld [vmem:[#allocation5 + $0x390] sm:$0xff]  ;;  %v1219_v50 = vpack.c.bf16 %v269_v40, %v268_v39  ;;  %v1221_v52 = vpack.c.bf16 %v287_v45, %v286_v44 }
  0x70   : > { %1208 = vmatpush3.bf16.msra.mxu1 %v1207_v13  ;;  %1178 = vmatprep.subr.bf16.mxu0 %v1177_v14  ;;  %v319_v47 = vld [vmem:[#allocation5 + $0x398] sm:$0xff]  ;;  %v180_v48 = vld [vmem:[%s1711_s3] sm:$0xff]  ;;  %v182_v49 = vld [vmem:[%s1711_s3 + $0x10] sm:$0xff]  ;;  %v1251_v51 = vpack.c.bf16 %v301_v43, %v300_v41 }
  0x71   : > { %1210 = vmatprep.subr.bf16.mxu1 %v1209_v18  ;;  %v270_v53 = vld [vmem:[#allocation5 + $0x210] sm:$0xff]  ;;  %v271_v54 = vld [vmem:[#allocation5 + $0x218] sm:$0xff]  ;;  %v1253_v56 = vpack.c.bf16 %v319_v47, %v318_v46  ;;  %v288_v58 = vld [vmem:[#allocation5 + $0x2a0] sm:$0xff] }
  0x72   : > { %v302_v55 = vld [vmem:[#allocation5 + $0x310] sm:$0xff]  ;;  %v303_v57 = vld [vmem:[#allocation5 + $0x318] sm:$0xff]  ;;  %v289_v59 = vld [vmem:[#allocation5 + $0x2a8] sm:$0xff]  ;;  %v1223_v62 = vpack.c.bf16 %v271_v54, %v270_v53 }
  0x73   : > { %1180 = vmatpush3.bf16.msra.mxu0 %v1179_v24  ;;  %v320_v60 = vld [vmem:[#allocation5 + $0x3a0] sm:$0xff]  ;;  %v321_v61 = vld [vmem:[#allocation5 + $0x3a8] sm:$0xff]  ;;  %v1255_v63 = vpack.c.bf16 %v303_v57, %v302_v55  ;;  %v1225_v0 = vpack.c.bf16 %v289_v59, %v288_v58  ;;  %v290_v6 = vld [vmem:[#allocation5 + $0x2b0] sm:$0xff] }
  0x74   : > { %1212 = vmatpush3.bf16.msra.mxu1 %v1211_v25  ;;  %1182 = vmatprep.subr.bf16.mxu0 %v1181_v26  ;;  %v272_v1 = vld [vmem:[#allocation5 + $0x220] sm:$0xff]  ;;  %v273_v2 = vld [vmem:[#allocation5 + $0x228] sm:$0xff]  ;;  %v1257_v4 = vpack.c.bf16 %v321_v61, %v320_v60  ;;  %v291_v7 = vld [vmem:[#allocation5 + $0x2b8] sm:$0xff] }
  0x75   : > { %1214 = vmatprep.subr.bf16.mxu1 %v1213_v30  ;;  %v304_v3 = vld [vmem:[#allocation5 + $0x320] sm:$0xff]  ;;  %v305_v5 = vld [vmem:[#allocation5 + $0x328] sm:$0xff]  ;;  %v322_v8 = vld [vmem:[#allocation5 + $0x3b0] sm:$0xff]  ;;  %v1227_v11 = vpack.c.bf16 %v273_v2, %v272_v1  ;;  %v1229_v16 = vpack.c.bf16 %v291_v7, %v290_v6 }
  0x76   : > { %v323_v9 = vld [vmem:[#allocation5 + $0x3b8] sm:$0xff]  ;;  %v274_v10 = vld [vmem:[#allocation5 + $0x230] sm:$0xff]  ;;  %v1259_v15 = vpack.c.bf16 %v305_v5, %v304_v3  ;;  %v292_v17 = vld [vmem:[#allocation5 + $0x2c0] sm:$0xff] }
  0x77   : > { %1184 = vmatpush3.bf16.msra.mxu0 %v1183_v36  ;;  %v275_v12 = vld [vmem:[#allocation5 + $0x238] sm:$0xff]  ;;  %v306_v13 = vld [vmem:[#allocation5 + $0x330] sm:$0xff]  ;;  %v193_v18 = vld [vmem:[%s1711_s3 + $0x68] sm:$0xff]  ;;  %v1261_v20 = vpack.c.bf16 %v323_v9, %v322_v8 }
  0x78   : > { %1216 = vmatpush3.bf16.msra.mxu1 %v1215_v37  ;;  %1218 = vmatprep.subr.bf16.mxu0 %v1217_v38  ;;  %v307_v14 = vld [vmem:[#allocation5 + $0x338] sm:$0xff]  ;;  %v293_v21 = vld [vmem:[#allocation5 + $0x2c8] sm:$0xff]  ;;  %v192_v22 = vld [vmem:[%s1711_s3 + $0x60] sm:$0xff]  ;;  %v1231_v26 = vpack.c.bf16 %v275_v12, %v274_v10 }
  0x79   : > { %1250 = vmatprep.subr.bf16.mxu1 %v1249_v42  ;;  %v195_v19 = vld [vmem:[%s1711_s3 + $0x78] sm:$0xff]  ;;  %v194_v23 = vld [vmem:[%s1711_s3 + $0x70] sm:$0xff]  ;;  %v324_v24 = vld [vmem:[#allocation5 + $0x3c0] sm:$0xff]  ;;  %v1263_v29 = vpack.c.bf16 %v307_v14, %v306_v13  ;;  %v1233_v30 = vpack.c.bf16 %v293_v21, %v292_v17 }
  0x7a   : > { %460 = vmatmul.mubr.f32.vlgmr.msra.gmra.mrb[0].mxu0 %v180_v48  ;;  %v325_v25 = vld [vmem:[#allocation5 + $0x3c8] sm:$0xff]  ;;  %v276_v27 = vld [vmem:[#allocation5 + $0x240] sm:$0xff]  ;;  %v187_v33 = vld [vmem:[%s1711_s3 + $0x38] sm:$0xff] }
  0x7b   : > { %535 = vmatmul.mubr.f32.vlgmr.msra.gmra.mrb[0].mxu1 %v182_v49  ;;  %1220 = vmatpush3.bf16.msra.mxu0 %v1219_v50  ;;  %v277_v28 = vld [vmem:[#allocation5 + $0x248] sm:$0xff]  ;;  %v308_v31 = vld [vmem:[#allocation5 + $0x340] sm:$0xff]  ;;  %v1265_v34 = vpack.c.bf16 %v325_v25, %v324_v24  ;;  %v294_v36 = vld [vmem:[#allocation5 + $0x2d0] sm:$0xff] }
  0x7c   : > { %1252 = vmatpush3.bf16.msra.mxu1 %v1251_v51  ;;  %1222 = vmatprep.subr.bf16.mxu0 %v1221_v52  ;;  %v185_v32 = vld [vmem:[%s1711_s3 + $0x28] sm:$0xff]  ;;  %v295_v37 = vld [vmem:[#allocation5 + $0x2d8] sm:$0xff]  ;;  %v326_v38 = vld [vmem:[#allocation5 + $0x3d0] sm:$0xff]  ;;  %v1235_v40 = vpack.c.bf16 %v277_v28, %v276_v27  ;;  %v1548_v27 = vmov 0.0|0.0  }
  0x7d   : > { %1254 = vmatprep.subr.bf16.mxu1 %v1253_v56  ;;  %464 = vmatprep.mubr.f32.mxu0 %v193_v18  ;;  %v309_v35 = vld [vmem:[#allocation5 + $0x348] sm:$0xff]  ;;  %v327_v39 = vld [vmem:[#allocation5 + $0x3d8] sm:$0xff]  ;;  %v1237_v42 = vpack.c.bf16 %v295_v37, %v294_v36  ;;  %v278_v43 = vld [vmem:[#allocation5 + $0x250] sm:$0xff] }
  0x7e   : > { %539 = vmatprep.mubr.f32.mxu1 %v195_v19  ;;  %465 = vmatmul.mubr.f32.gmra.mrb[2].mxu0 %v192_v22  ;;  %v1267_v41 = vpack.c.bf16 %v309_v35, %v308_v31  ;;  %v279_v44 = vld [vmem:[#allocation5 + $0x258] sm:$0xff]  ;;  %v310_v45 = vld [vmem:[#allocation5 + $0x350] sm:$0xff]  ;;  %v1269_v46 = vpack.c.bf16 %v327_v39, %v326_v38  ;;  %v296_v48 = vld [vmem:[#allocation5 + $0x2e0] sm:$0xff] }
  0x7f   : > { %1224 = vmatpush3.bf16.msra.mxu0 %v1223_v62  ;;  %540 = vmatmul.mubr.f32.gmra.mrb[2].mxu1 %v194_v23  ;;  %v311_v47 = vld [vmem:[#allocation5 + $0x358] sm:$0xff]  ;;  %v297_v49 = vld [vmem:[#allocation5 + $0x2e8] sm:$0xff]  ;;  %v328_v50 = vld [vmem:[#allocation5 + $0x3e0] sm:$0xff]  ;;  %v1239_v52 = vpack.c.bf16 %v279_v44, %v278_v43 }
  0x80   : > { %1256 = vmatpush3.bf16.msra.mxu1 %v1255_v63  ;;  %1226 = vmatprep.subr.bf16.mxu0 %v1225_v0  ;;  %v329_v51 = vld [vmem:[#allocation5 + $0x3e8] sm:$0xff]  ;;  %v1271_v53 = vpack.c.bf16 %v311_v47, %v310_v45  ;;  %v1241_v54 = vpack.c.bf16 %v297_v49, %v296_v48  ;;  %v280_v55 = vld [vmem:[#allocation5 + $0x260] sm:$0xff]  ;;  %v298_v60 = vld [vmem:[#allocation5 + $0x2f0] sm:$0xff] }
  0x81   : > { %1258 = vmatprep.subr.bf16.mxu1 %v1257_v4  ;;  %609 = vmatprep.mubr.f32.mxu0 %v185_v32  ;;  %v281_v56 = vld [vmem:[#allocation5 + $0x268] sm:$0xff]  ;;  %v312_v57 = vld [vmem:[#allocation5 + $0x360] sm:$0xff]  ;;  %v1273_v58 = vpack.c.bf16 %v329_v51, %v328_v50  ;;  %v299_v61 = vld [vmem:[#allocation5 + $0x2f8] sm:$0xff] }
  0x82   : > { %684 = vmatprep.mubr.f32.mxu1 %v187_v33  ;;  %v313_v59 = vld [vmem:[#allocation5 + $0x368] sm:$0xff]  ;;  %v330_v62 = vld [vmem:[#allocation5 + $0x3f0] sm:$0xff]  ;;  %v331_v63 = vld [vmem:[#allocation5 + $0x3f8] sm:$0xff]  ;;  %v1243_v0 = vpack.c.bf16 %v281_v56, %v280_v55  ;;  %v1245_v2 = vpack.c.bf16 %v299_v61, %v298_v60 }
  0x83   : > { %1228 = vmatpush3.bf16.msra.mxu0 %v1227_v11  ;;  %v1275_v1 = vpack.c.bf16 %v313_v59, %v312_v57  ;;  %v282_v3 = vld [vmem:[#allocation5 + $0x270] sm:$0xff]  ;;  %v283_v4 = vld [vmem:[#allocation5 + $0x278] sm:$0xff]  ;;  %v1277_v6 = vpack.c.bf16 %v331_v63, %v330_v62  ;;  %v348_v8 = vld [vmem:[#allocation5 + $0x480] sm:$0xff] }
  0x84   : > { %1260 = vmatpush3.bf16.msra.mxu1 %v1259_v15  ;;  %1230 = vmatprep.subr.bf16.mxu0 %v1229_v16  ;;  %v314_v5 = vld [vmem:[#allocation5 + $0x370] sm:$0xff]  ;;  %v315_v7 = vld [vmem:[#allocation5 + $0x378] sm:$0xff]  ;;  %v349_v9 = vld [vmem:[#allocation5 + $0x488] sm:$0xff]  ;;  %v1247_v10 = vpack.c.bf16 %v283_v4, %v282_v3 }
  0x85   : > { %1262 = vmatprep.subr.bf16.mxu1 %v1261_v20  ;;  %v1279_v11 = vpack.c.bf16 %v315_v7, %v314_v5  ;;  %v1281_v12 = vpack.c.bf16 %v349_v9, %v348_v8  ;;  %v332_v13 = vld [vmem:[#allocation5 + $0x400] sm:$0xff]  ;;  %v333_v14 = vld [vmem:[#allocation5 + $0x408] sm:$0xff]  ;;  %v350_v17 = vld [vmem:[#allocation5 + $0x490] sm:$0xff] }
  0x86   : > { %v364_v15 = vld [vmem:[#allocation5 + $0x500] sm:$0xff]  ;;  %v365_v16 = vld [vmem:[#allocation5 + $0x508] sm:$0xff]  ;;  %v351_v18 = vld [vmem:[#allocation5 + $0x498] sm:$0xff]  ;;  %v1283_v21 = vpack.c.bf16 %v333_v14, %v332_v13 }
  0x87   : > { %1232 = vmatpush3.bf16.msra.mxu0 %v1231_v26  ;;  %v184_v19 = vld [vmem:[%s1711_s3 + $0x20] sm:$0xff]  ;;  %v186_v20 = vld [vmem:[%s1711_s3 + $0x30] sm:$0xff]  ;;  %v197_v22 = vld [vmem:[%s1711_s3 + $0x88] sm:$0xff]  ;;  %v1314_v23 = vpack.c.bf16 %v365_v16, %v364_v15  ;;  %v1285_v28 = vpack.c.bf16 %v351_v18, %v350_v17 }
  0x88   : > { %1264 = vmatpush3.bf16.msra.mxu1 %v1263_v29  ;;  %1234 = vmatprep.subr.bf16.mxu0 %v1233_v30  ;;  %v334_v24 = vld [vmem:[#allocation5 + $0x410] sm:$0xff]  ;;  %v335_v25 = vld [vmem:[#allocation5 + $0x418] sm:$0xff]  ;;  %v352_v30 = vld [vmem:[#allocation5 + $0x4a0] sm:$0xff] }
  0x89   : > { %1266 = vmatprep.subr.bf16.mxu1 %v1265_v34  ;;  %v366_v26 = vld [vmem:[#allocation5 + $0x510] sm:$0xff]  ;;  %v367_v29 = vld [vmem:[#allocation5 + $0x518] sm:$0xff]  ;;  %v353_v31 = vld [vmem:[#allocation5 + $0x4a8] sm:$0xff]  ;;  %v1287_v34 = vpack.c.bf16 %v335_v25, %v334_v24 }
  0x8a   : > { %v196_v32 = vld [vmem:[%s1711_s3 + $0x80] sm:$0xff]  ;;  %v199_v33 = vld [vmem:[%s1711_s3 + $0x98] sm:$0xff]  ;;  %v198_v35 = vld [vmem:[%s1711_s3 + $0x90] sm:$0xff]  ;;  %v1317_v36 = vpack.c.bf16 %v367_v29, %v366_v26  ;;  %v1289_v37 = vpack.c.bf16 %v353_v31, %v352_v30 }
  0x8b   : > { %1236 = vmatpush3.bf16.msra.mxu0 %v1235_v40  ;;  %v336_v38 = vld [vmem:[#allocation5 + $0x420] sm:$0xff]  ;;  %v337_v39 = vld [vmem:[#allocation5 + $0x428] sm:$0xff]  ;;  %v355_v43 = vld [vmem:[#allocation5 + $0x4b8] sm:$0xff] }
  0x8c   : > { %1268 = vmatpush3.bf16.msra.mxu1 %v1267_v41  ;;  %1238 = vmatprep.subr.bf16.mxu0 %v1237_v42  ;;  %v368_v40 = vld [vmem:[#allocation5 + $0x520] sm:$0xff]  ;;  %v369_v41 = vld [vmem:[#allocation5 + $0x528] sm:$0xff]  ;;  %v354_v42 = vld [vmem:[#allocation5 + $0x4b0] sm:$0xff]  ;;  %v1291_v45 = vpack.c.bf16 %v337_v39, %v336_v38 }
  0x8d   : > { %1270 = vmatprep.subr.bf16.mxu1 %v1269_v46  ;;  %v189_v44 = vld [vmem:[%s1711_s3 + $0x48] sm:$0xff]  ;;  %v191_v46 = vld [vmem:[%s1711_s3 + $0x58] sm:$0xff]  ;;  %v1320_v47 = vpack.c.bf16 %v369_v41, %v368_v40  ;;  %v1293_v48 = vpack.c.bf16 %v355_v43, %v354_v42  ;;  %v338_v49 = vld [vmem:[#allocation5 + $0x430] sm:$0xff] }
  0x8e   : > { %v339_v50 = vld [vmem:[#allocation5 + $0x438] sm:$0xff]  ;;  %v370_v51 = vld [vmem:[#allocation5 + $0x530] sm:$0xff]  ;;  %v341_v59 = vld [vmem:[#allocation5 + $0x448] sm:$0xff] }
  0x8f   : > { %1240 = vmatpush3.bf16.msra.mxu0 %v1239_v52  ;;  %v371_v52 = vld [vmem:[#allocation5 + $0x538] sm:$0xff]  ;;  %v1295_v55 = vpack.c.bf16 %v339_v50, %v338_v49  ;;  %v372_v60 = vld [vmem:[#allocation5 + $0x540] sm:$0xff]  ;;  %v373_v61 = vld [vmem:[#allocation5 + $0x548] sm:$0xff] }
  0x90   : > { %1272 = vmatpush3.bf16.msra.mxu1 %v1271_v53  ;;  %1242 = vmatprep.subr.bf16.mxu0 %v1241_v54  ;;  %v356_v53 = vld [vmem:[#allocation5 + $0x4c0] sm:$0xff]  ;;  %v357_v54 = vld [vmem:[#allocation5 + $0x4c8] sm:$0xff]  ;;  %v1323_v56 = vpack.c.bf16 %v371_v52, %v370_v51  ;;  %v358_v62 = vld [vmem:[#allocation5 + $0x4d0] sm:$0xff] }
  0x91   : > { %1274 = vmatprep.subr.bf16.mxu1 %v1273_v58  ;;  %v1297_v57 = vpack.c.bf16 %v357_v54, %v356_v53  ;;  %v340_v58 = vld [vmem:[#allocation5 + $0x440] sm:$0xff]  ;;  %v359_v63 = vld [vmem:[#allocation5 + $0x4d8] sm:$0xff]  ;;  %v342_v3 = vld [vmem:[#allocation5 + $0x450] sm:$0xff] }
  0x92   : > { %v343_v4 = vld [vmem:[#allocation5 + $0x458] sm:$0xff]  ;;  %v374_v5 = vld [vmem:[#allocation5 + $0x550] sm:$0xff]  ;;  %v360_v7 = vld [vmem:[#allocation5 + $0x4e0] sm:$0xff] }
  0x93   : > { %1244 = vmatpush3.bf16.msra.mxu0 %v1243_v0  ;;  %v1299_v0 = vpack.c.bf16 %v341_v59, %v340_v58  ;;  %v361_v8 = vld [vmem:[#allocation5 + $0x4e8] sm:$0xff]  ;;  %v1303_v9 = vpack.c.bf16 %v343_v4, %v342_v3  ;;  %v376_v14 = vld [vmem:[#allocation5 + $0x560] sm:$0xff]  ;;  %v362_v16 = vld [vmem:[#allocation5 + $0x4f0] sm:$0xff] }
  0x94   : > { %1276 = vmatpush3.bf16.msra.mxu1 %v1275_v1  ;;  %1246 = vmatprep.subr.bf16.mxu0 %v1245_v2  ;;  %v1326_v1 = vpack.c.bf16 %v373_v61, %v372_v60  ;;  %v1301_v2 = vpack.c.bf16 %v359_v63, %v358_v62  ;;  %v345_v13 = vld [vmem:[#allocation5 + $0x468] sm:$0xff]  ;;  %v363_v17 = vld [vmem:[#allocation5 + $0x4f8] sm:$0xff]  ;;  %v188_v30 = vld [vmem:[%s1711_s3 + $0x40] sm:$0xff] }
  0x95   : > { %1278 = vmatprep.subr.bf16.mxu1 %v1277_v6  ;;  %v375_v6 = vld [vmem:[#allocation5 + $0x558] sm:$0xff]  ;;  %v377_v15 = vld [vmem:[#allocation5 + $0x568] sm:$0xff]  ;;  %vm1342_vm3 = vmpackc.low %vm391_vm1, %vm1549_vm2 }
  0x96   : > { %v379_v24 = vld [vmem:[#allocation5 + $0x578] sm:$0xff]  ;;  %v381_v29 = vld [vmem:[#allocation5 + $0x588] sm:$0xff]  ;;  %v202_v39 = vld [vmem:[%s1711_s3 + $0xb0] sm:$0xff] }
  0x97   : > { %1248 = vmatpush3.bf16.msra.mxu0 %v1247_v10  ;;  %v1329_v10 = vpack.c.bf16 %v375_v6, %v374_v5  ;;  %v203_v38 = vld [vmem:[%s1711_s3 + $0xb8] sm:$0xff] }
  0x98   : > { %1280 = vmatpush3.bf16.msra.mxu1 %v1279_v11  ;;  %1282 = vmatprep.subr.bf16.mxu0 %v1281_v12  ;;  %v1305_v11 = vpack.c.bf16 %v361_v8, %v360_v7  ;;  %v344_v12 = vld [vmem:[#allocation5 + $0x460] sm:$0xff] }
  0x99   : > { %1313 = vmatprep.subr.bf16.mxu1 %v1548_v27  ;;  %v1307_v18 = vpack.c.bf16 %v345_v13, %v344_v12 }
  0x9a   : > { %610 = vmatmul.mubr.f32.vlgmr.msra.gmra.mrb[4].mxu0 %v184_v19  ;;  %v1332_v19 = vpack.c.bf16 %v377_v15, %v376_v14 }
  0x9b   : > { %685 = vmatmul.mubr.f32.vlgmr.msra.gmra.mrb[4].mxu1 %v186_v20  ;;  %1284 = vmatpush3.bf16.msra.mxu0 %v1283_v21  ;;  %v1309_v20 = vpack.c.bf16 %v363_v17, %v362_v16  ;;  %v346_v21 = vld [vmem:[#allocation5 + $0x470] sm:$0xff] }
  0x9c   : > { %1315 = vmatpush1.bf16.msra.mxu1 %v1314_v23  ;;  %614 = vmatprep.mubr.f32.mxu0 %v197_v22  ;;  %v347_v22 = vld [vmem:[#allocation5 + $0x478] sm:$0xff]  ;;  %v378_v23 = vld [vmem:[#allocation5 + $0x570] sm:$0xff] }
  0x9d   : > { %1286 = vmatprep.subr.bf16.mxu0 %v1285_v28  ;;  %1316 = vmatprep.subr.bf16.mxu1 %v1548_v27  ;;  %v1311_v25 = vpack.c.bf16 %v347_v22, %v346_v21  ;;  %v1335_v26 = vpack.c.bf16 %v379_v24, %v378_v23  ;;  %v380_v28 = vld [vmem:[#allocation5 + $0x580] sm:$0xff] }
  0x9e   : > { %615 = vmatmul.mubr.f32.gmra.mrb[6].mxu0 %v196_v32  ;;  %689 = vmatprep.mubr.f32.mxu1 %v199_v33  ;;  %v1338_v31 = vpack.c.bf16 %v381_v29, %v380_v28  ;;  %v201_v32 = vld [vmem:[%s1711_s3 + $0xa8] sm:$0xff]  ;;  %v382_v33 = vld [vmem:[#allocation5 + $0x590] sm:$0xff] }
  0x9f   : > { %1288 = vmatpush3.bf16.msra.mxu0 %v1287_v34  ;;  %690 = vmatmul.mubr.f32.gmra.mrb[6].mxu1 %v198_v35  ;;  %v383_v34 = vld [vmem:[#allocation5 + $0x598] sm:$0x1]  ;;  %v200_v35 = vld [vmem:[%s1711_s3 + $0xa0] sm:$0xff] }
  0xa0   : > { %1318 = vmatpush1.bf16.msra.mxu1 %v1317_v36  ;;  %1290 = vmatprep.subr.bf16.mxu0 %v1289_v37  ;;  %v1341_v36 = vpack.c.bf16 %v383_v34, %v382_v33  ;;  %v190_v37 = vld [vmem:[%s1711_s3 + $0x50] sm:$0xff] }
  0xa1   : > { %1319 = vmatprep.subr.bf16.mxu1 %v1548_v27  ;;  %759 = vmatprep.mubr.f32.mxu0 %v189_v44 }
  0xa2   : > { %955 = vmatprep.mubr.msk.f32.mxu1 %vm384_vm0, %v191_v46 }
  0xa3   : > { %1292 = vmatpush3.bf16.msra.mxu0 %v1291_v45 }
  0xa4   : > { %1321 = vmatpush1.bf16.msra.mxu1 %v1320_v47  ;;  %1294 = vmatprep.subr.bf16.mxu0 %v1293_v48 }
  0xa5   : > { %1322 = vmatprep.subr.bf16.mxu1 %v1548_v27 }
  0xa7   : > { %1296 = vmatpush3.bf16.msra.mxu0 %v1295_v55 }
  0xa8   : > { %1324 = vmatpush1.bf16.msra.mxu1 %v1323_v56  ;;  %1298 = vmatprep.subr.bf16.mxu0 %v1297_v57 }
  0xa9   : > { %1325 = vmatprep.subr.bf16.mxu1 %v1548_v27 }
  0xab   : > { %1300 = vmatpush3.bf16.msra.mxu0 %v1299_v0 }
  0xac   : > { %1327 = vmatpush1.bf16.msra.mxu1 %v1326_v1  ;;  %1302 = vmatprep.subr.bf16.mxu0 %v1301_v2 }
  0xad   : > { %1328 = vmatprep.subr.bf16.mxu1 %v1548_v27 }
  0xaf   : > { %1304 = vmatpush3.bf16.msra.mxu0 %v1303_v9 }
  0xb0   : > { %1330 = vmatpush1.bf16.msra.mxu1 %v1329_v10  ;;  %1306 = vmatprep.subr.bf16.mxu0 %v1305_v11 }
  0xb1   : > { %1331 = vmatprep.subr.bf16.mxu1 %v1548_v27 }
  0xb3   : > { %1308 = vmatpush3.bf16.msra.mxu0 %v1307_v18 }
  0xb4   : > { %1333 = vmatpush1.bf16.msra.mxu1 %v1332_v19  ;;  %1310 = vmatprep.subr.bf16.mxu0 %v1309_v20 }
  0xb5   : > { %1334 = vmatprep.subr.bf16.mxu1 %v1548_v27 }
  0xb7   : > { %1312 = vmatpush3.bf16.msra.mxu0 %v1311_v25 }
  0xb8   : > { %1336 = vmatpush1.bf16.msra.mxu1 %v1335_v26 }
  0xb9   : > { %1337 = vmatprep.subr.bf16.mxu1 %v1548_v27 }
  0xba   : > { %760 = vmatmul.mubr.f32.vlgmr.msra.gmra.mrb[8].mxu0 %v188_v30 }
  0xbb   : > { %764 = vmatprep.mubr.f32.mxu0 %v201_v32 }
  0xbc   : > { %1339 = vmatpush1.bf16.msra.mxu1 %v1338_v31 }
  0xbd   : > { %1340 = vmatprep.subr.bf16.mxu1 %v1548_v27 }
  0xbe   : > { %765 = vmatmul.mubr.f32.gmra.mrb[10].mxu0 %v200_v35 }
  0xc0   : > { %1343 = vmatpush1.bf16.msk.msra.mxu1 %vm1342_vm3, %v1341_v36 }
  0xc3   : > { %835 = vmatmul.mubr.f32.vlgmr.msra.gmra.mrb[8].mxu1 %v190_v37 }
  0xc4   : > { %956 = vmatprep.mubr.msk.f32.mxu1 %vm384_vm0, %v203_v38 }
  0xc7   : > { %840 = vmatmul.mubr.f32.gmra.mrb[10].mxu1 %v202_v39 }
 0x14d   : > { %v995_v40 = vpop.f32.mrb[0].mxu0 }
 0x14e   : > { %v1033_v41 = vpop.f32.mrb[0].mxu1  ;;  %v996_v42 = vpop.f32.mrb[1].mxu0 }
 0x14f   : > { %v997_v43 = vadd.f32 %v996_v42, %v995_v40  ;;  %v1034_v44 = vpop.f32.mrb[1].mxu1 }
 0x150   : > { %v1035_v45 = vadd.f32 %v1034_v44, %v1033_v41 }
 0x151   : > { %v998_v47 = vpop.f32.mrb[2].mxu0 }
 0x152   : > { %v537_v46 = vadd.f32 %v1035_v45, %v997_v43  ;;  %v1036_v27 = vpop.f32.mrb[2].mxu1  ;;  %v999_v48 = vpop.f32.mrb[3].mxu0 }
 0x153   : > { %v1000_v49 = vadd.f32 %v999_v48, %v998_v47  ;;  %v1037_v50 = vpop.f32.mrb[3].mxu1 }
 0x154   : > { %v1038_v51 = vadd.f32 %v1037_v50, %v1036_v27 }
 0x156   : > { %v542_v52 = vadd.f32 %v1038_v51, %v1000_v49 }
 0x16d   : > { %v1071_v53 = vpop.f32.mrb[4].mxu0 }
 0x16e   : > { %v1109_v54 = vpop.f32.mrb[4].mxu1  ;;  %v1072_v55 = vpop.f32.mrb[5].mxu0 }
 0x16f   : > { %v1073_v56 = vadd.f32 %v1072_v55, %v1071_v53  ;;  %v1110_v57 = vpop.f32.mrb[5].mxu1 }
 0x170   : > { %v1111_v58 = vadd.f32 %v1110_v57, %v1109_v54 }
 0x171   : > { %v612_v59 = vadd.f32 %v1073_v56, %v537_v46  ;;  %v1074_v60 = vpop.f32.mrb[6].mxu0 }
 0x172   : > { %v1075_v61 = vpop.f32.mrb[7].mxu0  ;;  %v1112_v62 = vpop.f32.mrb[6].mxu1 }
 0x173   : > { %v687_v63 = vadd.f32 %v1111_v58, %v612_v59  ;;  %v1076_v0 = vadd.f32 %v1075_v61, %v1074_v60  ;;  %v1113_v1 = vpop.f32.mrb[7].mxu1 }
 0x174   : > { %v1114_v2 = vadd.f32 %v1113_v1, %v1112_v62 }
 0x175   : > { %v617_v3 = vadd.f32 %v1076_v0, %v542_v52 }
 0x177   : > { %v692_v4 = vadd.f32 %v1114_v2, %v617_v3 }
 0x18d   : > { %v1147_v5 = vpop.f32.mrb[8].mxu0 }
 0x18e   : > { %v1148_v6 = vpop.f32.mrb[9].mxu0 }
 0x18f   : > { %v1149_v7 = vadd.f32 %v1148_v6, %v1147_v5 }
 0x191   : > { %v1150_v8 = vpop.f32.mrb[10].mxu0  ;;  %v762_v9 = vadd.f32 %v1149_v7, %v687_v63 }
 0x192   : > { %v1151_v10 = vpop.f32.mrb[11].mxu0 }
 0x193   : > { %v1152_v11 = vadd.f32 %v1151_v10, %v1150_v8 }
 0x195   : > { %v767_v12 = vadd.f32 %v1152_v11, %v692_v4 }
 0x196   : > { %v836_v13 = vpop.f32.mrb[8].mxu1 }
 0x197   : > { %v837_v14 = vadd.f32 %v836_v13, %v762_v9  ;;  %v838_v15 = vpop.f32.mrb[9].mxu1 }
 0x199   : > { %845 = vst [vmem:[%s177_s17] sm:$0xff] %v837_v14 }
 0x19a   : > { %v841_v16 = vpop.f32.mrb[10].mxu1 }
 0x19b   : > { %v842_v17 = vadd.f32 %v841_v16, %v767_v12  ;;  %v843_v18 = vpop.f32.mrb[11].mxu1 }
 0x19d   : > { %846 = vst [vmem:[%s177_s17 + $0x8] sm:$0xff] %v842_v17 }
 0x19e   : > { %1483 = shalt.err (!%p1480_p7)
}
 0x19f   : > { %s1484_s24 = scalar_lea.hbm %s1764_s4, 256  ;;  %s1488_s26 = scalar_lea.hbm %s1810_s2, 512 }
 0x1a0   : > { %p1485_p9 = scmp.ne.s32.totalorder %s1764_s4, %s1484_s24  ;;  %p1489_p5 = scmp.lt.u32.totalorder %s1764_s4, %s1810_s2 }
 0x1a1   : > { %p1490_p11 = scmp.lt.u32.totalorder %s1488_s26, %s1484_s24  ;;  %p1492_p4 = scmp.lt.u32.totalorder %s1484_s24, %s1764_s4 }
 0x1a2   : > { %p1486_p2 = pnand %p1485_p9, %p1659_p12 }
 0x1a3   : > { %p1491_p1 = por %p1490_p11, %p1489_p5 }
 0x1a4   : > { %p1487_p0 = pneg %p1486_p2 }
 0x1a5   : > { %p1493_p6 = por %p1492_p4, %p1491_p1 }
 0x1a7   : > { %p1494_p8 = pnand %p1493_p6, %p1487_p0 }
 0x1a9   : > { %1497 = shalt.err (!%p1494_p8)
}
 0x1aa   : > { %s1551_s3 = smov 128   ;;  %s1552_s15 = smov 8  }
 0x1ab   : > { %1353 = dma.vmem_to_hbm [thread:$0]  (%p1659_p12), %s1759_s27, 256, %s1764_s4, %s848_s5, %s1551_s3, %s1551_s3, %s1552_s15  }
 0x1ac PF: > { %s876_s17 = sand.u32 1, %s1528_s9   ;;  %p1825_p10 = scmp.ne.s32.totalorder %s1815_s16, 0 }
 0x1ad   : > { %p1826_p13 = scmp.ge.s32.totalorder %s1540_s12, 2  ;;  %s877_s19 = scalar_lea.sflag [#allocation4], %s876_s17 }
 0x1af   : > { %p1364_p3 = pnand %p1826_p13, %p1825_p10 }
 0x1b1   : > { %1523 = dma.done.wait (!%p1364_p3), %s877_s19, 256  }
 0x1b2   : > { %1525 = vsyncadd (!%p1364_p3), %s877_s19, 4294967040  ;;  %p16_p7 = scmp.ge.s32.totalorder %s1624_s21, 4   ;;  %s1827_s9 = smov %s1532_s10 }
 0x1b3   : > { %s1828_s10 = smov %s1536_s11  ;;  %s1829_s11 = smov %s1655_s8 }
 0x1b4   : > { %s1830_s12 = smov %s1624_s21  ;;  %18 = sbr.rel (!%p16_p7) target bundleno = 6 (0x6), region = 77 }
 0x1bb   :  { %882 = vsyncpa [#allocation3], 1 }
 0x1bc   :  { %884 = vsyncpa [#allocation3 + $0x1], 1 }
 0x1bd   :  { %885 = vsyncpa [#allocation6], 1 }
 0x1be   :  { %886 = vsyncpa [#allocation4], 1 }
 0x1bf   :  { %888 = vsyncpa [#allocation4 + $0x1], 1 }

</bundles_post_ra>
